<compile_context>
chip_gen: v7x
topology: tpu7x:2x2x1
jax: 0.10.0
libtpu: 0.0.40
codegen_flags: <defaults>
</compile_context>

<pallas_src>
import functools
import math

import jax
import jax.numpy as jnp
import numpy as np
from jax.experimental import pallas as pl
from jax.experimental.pallas import tpu as pltpu


def _mha_kernel(*refs, n_seq, head_dim, inv_scale, return_attention):
    """One grid step = one (batch, q_tile, head).  Heads is the reduction axis."""
    idx = 0
    q_ref = refs[idx]; idx += 1
    if n_seq == 1:                       # self-attention, single q tile: reuse the q block
        kv_ref, k_ref, v_ref = q_ref, None, None
    elif n_seq == 2:                     # key is value (shared source)
        kv_ref = refs[idx]; idx += 1
        k_ref = v_ref = None
    else:                                # general cross-attention
        kv_ref = None
        k_ref = refs[idx]; idx += 1
        v_ref = refs[idx]; idx += 1
    wq_ref = refs[idx]; idx += 1         # (1, H, hd)      bf16
    bq_ref = refs[idx]; idx += 1         # (1, 1, hd)      f32
    wkv_ref = refs[idx]; idx += 1        # (1, H, 2*hd)    bf16
    bkv_ref = refs[idx]; idx += 1        # (1, 1, 2*hd)    f32
    wo_ref = refs[idx]; idx += 1         # (1, hd, H)      bf16
    bo_ref = refs[idx]; idx += 1         # (1, H)          f32
    x_ref = refs[idx]; idx += 1          # (1, TQ, H)      out (accumulated over heads)
    attn_ref = None
    if return_attention:
        attn_ref = refs[idx]; idx += 1   # (1, 1, TQ, SK)  out
    acc_ref = refs[idx]                  # (TQ, H)         f32 VMEM scratch

    h = pl.program_id(2)
    hd = head_dim

    # ---- per-head Q projection on the query tile (bf16 MXU, f32 accumulate) ----
    xq = q_ref[0].astype(jnp.bfloat16)                                   # (TQ, H)
    q = jnp.dot(xq, wq_ref[0], preferred_element_type=jnp.float32) + bq_ref[0]
    q = q * jnp.float32(inv_scale)       # fold 1/sqrt(head_dim) once into Q
    qb = q.astype(jnp.bfloat16)                                          # (TQ, hd)

    # ---- per-head K/V projection on the full key/value sequence ----
    if n_seq <= 2:
        xkv = kv_ref[0].astype(jnp.bfloat16)                             # (SK, H)
        kv = jnp.dot(xkv, wkv_ref[0], preferred_element_type=jnp.float32) + bkv_ref[0]
        k = kv[:, :hd]
        v = kv[:, hd:]
    else:
        xk = k_ref[0].astype(jnp.bfloat16)
        xv = v_ref[0].astype(jnp.bfloat16)
        w = wkv_ref[0]
        b = bkv_ref[0]
        k = jnp.dot(xk, w[:, :hd], preferred_element_type=jnp.float32) + b[:, :hd]
        v = jnp.dot(xv, w[:, hd:], preferred_element_type=jnp.float32) + b[:, hd:]
    kb = k.astype(jnp.bfloat16)
    vb = v.astype(jnp.bfloat16)

    # ---- scores + softmax over the key axis (only one head's (TQ, SK) block live) ----
    s = jnp.einsum("qd,kd->qk", qb, kb, preferred_element_type=jnp.float32)
    m = jnp.max(s, axis=-1, keepdims=True)
    p = jnp.exp(s - m)
    l = jnp.sum(p, axis=-1, keepdims=True)

    if return_attention:
        attn = p / l                              # exact division -> rows sum to 1 (parity)
        attn_ref[0, 0] = attn.astype(attn_ref.dtype)
        ctx = jnp.dot(attn.astype(jnp.bfloat16), vb,
                      preferred_element_type=jnp.float32)                # (TQ, hd)
    else:
        # Normalize after the PV matmul: TQ*hd muls instead of TQ*SK; EUP recip is free.
        ctx = jnp.dot(p.astype(jnp.bfloat16), vb,
                      preferred_element_type=jnp.float32)
        ctx = ctx * pl.reciprocal(l, approx=True)

    # ---- head-merge folded into fc_o: accumulate ctx_h @ wo_h over the head axis ----
    part = jnp.dot(ctx.astype(jnp.bfloat16), wo_ref[0],
                   preferred_element_type=jnp.float32)                   # (TQ, H)

    @pl.when(h == 0)
    def _():
        acc_ref[...] = jnp.zeros_like(acc_ref)

    acc_ref[...] += part

    @pl.when(h == pl.num_programs(2) - 1)
    def _():
        x_ref[0] = (acc_ref[...] + bo_ref[...]).astype(x_ref.dtype)


def prepare_mha_params(params, n_heads):
    """One-time parameter prep: fuse/split/cast torch-style Linear weights per head."""
    H = params["wq"].shape[0]
    assert H % n_heads == 0
    hd = H // n_heads

    def head_cols(w):  # torch (out, in) -> (n_heads, H_in, hd), bf16 for the MXU
        return w.T.reshape(H, n_heads, hd).transpose(1, 0, 2).astype(jnp.bfloat16)

    wq_h = head_cols(params["wq"])
    wkv_h = jnp.concatenate([head_cols(params["wk"]), head_cols(params["wv"])], axis=-1)
    bq_h = params["bq"].astype(jnp.float32).reshape(n_heads, 1, hd)
    bkv_h = jnp.concatenate(
        [params["bk"].reshape(n_heads, 1, hd), params["bv"].reshape(n_heads, 1, hd)],
        axis=-1).astype(jnp.float32)
    # fc_o with the head-merge folded in: (n_heads, hd, H); bias added once at finalize.
    wo_h = params["wo"].T.reshape(n_heads, hd, H).astype(jnp.bfloat16)
    bo = params["bo"].astype(jnp.float32).reshape(1, H)
    return dict(wq_h=wq_h, bq_h=bq_h, wkv_h=wkv_h, bkv_h=bkv_h, wo_h=wo_h, bo=bo,
                n_heads=n_heads, head_dim=hd, hid_dim=H)


def multi_head_attention(query, key, value, prep, *, return_attention=True, q_tile=256):
    """query/key/value: [B, S, H].  prep: output of prepare_mha_params."""
    B, SQ, H = query.shape
    SK = key.shape[1]
    n_heads, hd = prep["n_heads"], prep["head_dim"]
    assert H == prep["hid_dim"] and value.shape[1] == SK and value.shape[0] == B

    # Query tiling (bounds the live score block to (tq, SK)).
    tq = q_tile if (SQ > q_tile and SQ % q_tile == 0) else SQ
    n_q = SQ // tq

    self_attn = (query is key) and (key is value) and n_q == 1
    shared_kv = key is value

    if self_attn:
        seq_inputs, n_seq = (query,), 1
    elif shared_kv:
        seq_inputs, n_seq = (query, key), 2
    else:
        seq_inputs, n_seq = (query, key, value), 3

    q_spec = pl.BlockSpec((1, tq, H), lambda b, qi, h: (b, qi, 0))
    kv_spec = pl.BlockSpec((1, SK, H), lambda b, qi, h: (b, 0, 0))
    seq_specs = [q_spec] + [kv_spec] * (n_seq - 1)

    w_specs = [
        pl.BlockSpec((1, H, hd), lambda b, qi, h: (h, 0, 0)),        # wq_h
        pl.BlockSpec((1, 1, hd), lambda b, qi, h: (h, 0, 0)),        # bq_h
        pl.BlockSpec((1, H, 2 * hd), lambda b, qi, h: (h, 0, 0)),    # wkv_h
        pl.BlockSpec((1, 1, 2 * hd), lambda b, qi, h: (h, 0, 0)),    # bkv_h
        pl.BlockSpec((1, hd, H), lambda b, qi, h: (h, 0, 0)),        # wo_h
        pl.BlockSpec((1, H), lambda b, qi, h: (0, 0)),               # bo
    ]

    x_sds = jax.ShapeDtypeStruct((B, SQ, H), query.dtype)
    x_spec = pl.BlockSpec((1, tq, H), lambda b, qi, h: (b, qi, 0))   # resident across heads
    if return_attention:
        out_shape = (x_sds, jax.ShapeDtypeStruct((B, n_heads, SQ, SK), query.dtype))
        out_specs = [x_spec, pl.BlockSpec((1, 1, tq, SK), lambda b, qi, h: (b, h, qi, 0))]
    else:
        out_shape = (x_sds,)
        out_specs = [x_spec]

    kernel = functools.partial(
        _mha_kernel, n_seq=n_seq, head_dim=hd,
        inv_scale=1.0 / math.sqrt(hd), return_attention=return_attention)

    outs = pl.pallas_call(
        kernel,
        out_shape=out_shape,
        grid_spec=pltpu.PrefetchScalarGridSpec(
            num_scalar_prefetch=0,
            grid=(B, n_q, n_heads),
            in_specs=seq_specs + w_specs,
            out_specs=out_specs,
            scratch_shapes=[pltpu.VMEM((tq, H), jnp.float32)],       # x accumulator
        ),
        compiler_params=pltpu.CompilerParams(
            dimension_semantics=("parallel", "parallel", "arbitrary"),
            vmem_limit_bytes=48 * 1024 * 1024,
        ),
    )(*seq_inputs, prep["wq_h"], prep["bq_h"], prep["wkv_h"], prep["bkv_h"],
      prep["wo_h"], prep["bo"])

    if return_attention:
        return outs[0], outs[1]
    return outs[0], None


def _reference(query, key, value, params, *, n_heads):
    """Pure-JAX reference mirroring the PyTorch forward (eval mode)."""
    B, S, H = query.shape
    hd = H // n_heads

    def lin(x, w, b):
        return x @ w.T + b

    Q = lin(query, params["wq"], params["bq"])
    K = lin(key, params["wk"], params["bk"])
    V = lin(value, params["wv"], params["bv"])

    def split(t):
        return t.reshape(B, -1, n_heads, hd).transpose(0, 2, 1, 3)   # (B, nh, S, hd)

    Qh, Kh, Vh = split(Q), split(K), split(V)
    energy = jnp.einsum("bhqd,bhkd->bhqk", Qh, Kh) / jnp.sqrt(jnp.float32(hd))
    attn = jax.nn.softmax(energy, axis=-1)
    x = jnp.einsum("bhqk,bhkd->bhqd", attn, Vh)
    x = x.transpose(0, 2, 1, 3).reshape(B, -1, H)
    x = lin(x, params["wo"], params["bo"])
    return x, attn


if __name__ == "__main__":
    B, S, H, n_heads = 2, 8, 32, 4

    root = jax.random.PRNGKey(0)
    ks = jax.random.split(root, 14)
    bound = 1.0 / np.sqrt(H)
    params = {
        "wq": jax.random.uniform(ks[0], (H, H), jnp.float32, -bound, bound),
        "bq": jax.random.uniform(ks[1], (H,), jnp.float32, -bound, bound),
        "wk": jax.random.uniform(ks[2], (H, H), jnp.float32, -bound, bound),
        "bk": jax.random.uniform(ks[3], (H,), jnp.float32, -bound, bound),
        "wv": jax.random.uniform(ks[4], (H, H), jnp.float32, -bound, bound),
        "bv": jax.random.uniform(ks[5], (H,), jnp.float32, -bound, bound),
        "wo": jax.random.uniform(ks[6], (H, H), jnp.float32, -bound, bound),
        "bo": jax.random.uniform(ks[7], (H,), jnp.float32, -bound, bound),
    }
    prep = prepare_mha_params(params, n_heads)   # one-time weight fuse/split/cast

    query = jax.random.normal(ks[8], (B, S, H), jnp.float32)
    key_in = jax.random.normal(ks[9], (B, S, H), jnp.float32)
    value = jax.random.normal(ks[10], (B, S, H), jnp.float32)

    # Tolerance for bf16 MXU operands (f32 accumulation).
    tol = dict(rtol=2e-2, atol=2e-2)

    # 1) General (cross-attention) path, attention returned.
    x, attn = multi_head_attention(query, key_in, value, prep)
    x = jax.block_until_ready(x); attn = jax.block_until_ready(attn)
    x_ref, attn_ref = _reference(query, key_in, value, params, n_heads=n_heads)
    np.testing.assert_allclose(np.asarray(x), np.asarray(x_ref), **tol)
    np.testing.assert_allclose(np.asarray(attn), np.asarray(attn_ref), **tol)

    # 2) Self-attention fast path (single sequence DMA).
    xs, attns = multi_head_attention(query, query, query, prep)
    xs = jax.block_until_ready(xs); attns = jax.block_until_ready(attns)
    xs_ref, attns_ref = _reference(query, query, query, params, n_heads=n_heads)
    np.testing.assert_allclose(np.asarray(xs), np.asarray(xs_ref), **tol)
    np.testing.assert_allclose(np.asarray(attns), np.asarray(attns_ref), **tol)

    # 3) Shared key/value source (kv-fused path).
    xkv, attnkv = multi_head_attention(query, key_in, key_in, prep)
    xkv = jax.block_until_ready(xkv); attnkv = jax.block_until_ready(attnkv)
    xkv_ref, attnkv_ref = _reference(query, key_in, key_in, params, n_heads=n_heads)
    np.testing.assert_allclose(np.asarray(xkv), np.asarray(xkv_ref), **tol)
    np.testing.assert_allclose(np.asarray(attnkv), np.asarray(attnkv_ref), **tol)

    # 4) Attention writeback skipped + post-PV normalization (inference fast path).
    xn, attn_none = multi_head_attention(query, key_in, value, prep, return_attention=False)
    xn = jax.block_until_ready(xn)
    assert attn_none is None
    np.testing.assert_allclose(np.asarray(xn), np.asarray(x_ref), **tol)

    # 5) Query-tiled path (multiple q tiles, heads accumulated per tile).
    S2 = 16
    query2 = jax.random.normal(ks[11], (B, S2, H), jnp.float32)
    key2 = jax.random.normal(ks[12], (B, S2, H), jnp.float32)
    value2 = jax.random.normal(ks[13], (B, S2, H), jnp.float32)
    x2, attn2 = multi_head_attention(query2, key2, value2, prep, q_tile=8)
    x2 = jax.block_until_ready(x2); attn2 = jax.block_until_ready(attn2)
    x2_ref, attn2_ref = _reference(query2, key2, value2, params, n_heads=n_heads)
    np.testing.assert_allclose(np.asarray(x2), np.asarray(x2_ref), **tol)
    np.testing.assert_allclose(np.asarray(attn2), np.asarray(attn2_ref), **tol)

    print("KERNEL_OK")
</pallas_src>

<mosaic_0001>
module attributes {stable_mosaic.version = 11 : i64} {
  func.func @_mha_kernel(%arg0: i32, %arg1: i32, %arg2: i32, %arg3: memref<1x8x32xf32, #tpu.memory_space<vmem>>, %arg4: memref<1x8x32xf32, #tpu.memory_space<vmem>>, %arg5: memref<1x8x32xf32, #tpu.memory_space<vmem>>, %arg6: memref<1x32x8xbf16, #tpu.memory_space<vmem>>, %arg7: memref<1x1x8xf32, #tpu.memory_space<vmem>>, %arg8: memref<1x32x16xbf16, #tpu.memory_space<vmem>>, %arg9: memref<1x1x16xf32, #tpu.memory_space<vmem>>, %arg10: memref<1x8x32xbf16, #tpu.memory_space<vmem>>, %arg11: memref<1x32xf32, #tpu.memory_space<vmem>>, %arg12: memref<1x8x32xf32, #tpu.memory_space<vmem>>, %arg13: memref<1x1x8x8xf32, #tpu.memory_space<vmem>>, %arg14: memref<8x32xf32, #tpu.memory_space<vmem>>) attributes {dimension_semantics = [#tpu.dimension_semantics<parallel>, #tpu.dimension_semantics<parallel>, #tpu.dimension_semantics<arbitrary>], iteration_bounds = array<i64: 2, 1, 4>, scalar_prefetch = 0 : i64, scratch_operands = 1 : i64, tpu.core_type = #tpu.core_type<tc>, window_params = [{transform_indices = @transform_0, window_bounds = array<i64: 1, 8, 32>}, {transform_indices = @transform_1, window_bounds = array<i64: 1, 8, 32>}, {transform_indices = @transform_2, window_bounds = array<i64: 1, 8, 32>}, {transform_indices = @transform_3, window_bounds = array<i64: 1, 32, 8>}, {transform_indices = @transform_4, window_bounds = array<i64: 1, 1, 8>}, {transform_indices = @transform_5, window_bounds = array<i64: 1, 32, 16>}, {transform_indices = @transform_6, window_bounds = array<i64: 1, 1, 16>}, {transform_indices = @transform_7, window_bounds = array<i64: 1, 8, 32>}, {pipeline_mode = #tpu.pipeline_mode<synchronous>, transform_indices = @transform_8, window_bounds = array<i64: 1, 32>}, {transform_indices = @transform_9, window_bounds = array<i64: 1, 8, 32>}, {transform_indices = @transform_10, window_bounds = array<i64: 1, 1, 8, 8>}]} {
    %c0 = arith.constant 0 : index
    %c0_0 = arith.constant 0 : index
    %c0_1 = arith.constant 0 : index
    %0 = vector.load %arg3[%c0, %c0_0, %c0_1] : memref<1x8x32xf32, #tpu.memory_space<vmem>>, vector<1x8x32xf32>
    %1 = vector.shape_cast %0 : vector<1x8x32xf32> to vector<8x32xf32>
    %2 = arith.truncf %1 : vector<8x32xf32> to vector<8x32xbf16>
    %c0_2 = arith.constant 0 : index
    %c0_3 = arith.constant 0 : index
    %c0_4 = arith.constant 0 : index
    %3 = vector.load %arg6[%c0_2, %c0_3, %c0_4] : memref<1x32x8xbf16, #tpu.memory_space<vmem>>, vector<1x32x8xbf16>
    %4 = vector.shape_cast %3 : vector<1x32x8xbf16> to vector<32x8xbf16>
    %cst = arith.constant dense<0.000000e+00> : vector<8x8xf32>
    %5 = tpu.matmul %2, %4, %cst {dimension_numbers = #tpu.dot_dimension_numbers<[1], [0], [0], [1], [0, 0, 1, 1], [], []>} : vector<8x32xbf16>, vector<32x8xbf16>, vector<8x8xf32> -> vector<8x8xf32>
    %c0_5 = arith.constant 0 : index
    %c0_6 = arith.constant 0 : index
    %c0_7 = arith.constant 0 : index
    %6 = vector.load %arg7[%c0_5, %c0_6, %c0_7] : memref<1x1x8xf32, #tpu.memory_space<vmem>>, vector<1x1x8xf32>
    %7 = vector.shape_cast %6 : vector<1x1x8xf32> to vector<1x8xf32>
    %8 = vector.broadcast %7 : vector<1x8xf32> to vector<8x8xf32>
    %9 = arith.addf %5, %8 : vector<8x8xf32>
    %cst_8 = arith.constant 0.353553385 : f32
    %10 = vector.broadcast %cst_8 : f32 to vector<8x8xf32>
    %11 = arith.mulf %9, %10 : vector<8x8xf32>
    %12 = arith.truncf %11 : vector<8x8xf32> to vector<8x8xbf16>
    %c0_9 = arith.constant 0 : index
    %c0_10 = arith.constant 0 : index
    %c0_11 = arith.constant 0 : index
    %13 = vector.load %arg4[%c0_9, %c0_10, %c0_11] : memref<1x8x32xf32, #tpu.memory_space<vmem>>, vector<1x8x32xf32>
    %14 = vector.shape_cast %13 : vector<1x8x32xf32> to vector<8x32xf32>
    %15 = arith.truncf %14 : vector<8x32xf32> to vector<8x32xbf16>
    %c0_12 = arith.constant 0 : index
    %c0_13 = arith.constant 0 : index
    %c0_14 = arith.constant 0 : index
    %16 = vector.load %arg5[%c0_12, %c0_13, %c0_14] : memref<1x8x32xf32, #tpu.memory_space<vmem>>, vector<1x8x32xf32>
    %17 = vector.shape_cast %16 : vector<1x8x32xf32> to vector<8x32xf32>
    %18 = arith.truncf %17 : vector<8x32xf32> to vector<8x32xbf16>
    %c0_15 = arith.constant 0 : index
    %c0_16 = arith.constant 0 : index
    %c0_17 = arith.constant 0 : index
    %19 = vector.load %arg8[%c0_15, %c0_16, %c0_17] : memref<1x32x16xbf16, #tpu.memory_space<vmem>>, vector<1x32x16xbf16>
    %20 = vector.shape_cast %19 : vector<1x32x16xbf16> to vector<32x16xbf16>
    %c0_18 = arith.constant 0 : index
    %c0_19 = arith.constant 0 : index
    %c0_20 = arith.constant 0 : index
    %21 = vector.load %arg9[%c0_18, %c0_19, %c0_20] : memref<1x1x16xf32, #tpu.memory_space<vmem>>, vector<1x1x16xf32>
    %22 = vector.shape_cast %21 : vector<1x1x16xf32> to vector<1x16xf32>
    %23 = vector.extract_strided_slice %20 {offsets = [0, 0], sizes = [32, 8], strides = [1, 1]} : vector<32x16xbf16> to vector<32x8xbf16>
    %cst_21 = arith.constant dense<0.000000e+00> : vector<8x8xf32>
    %24 = tpu.matmul %15, %23, %cst_21 {dimension_numbers = #tpu.dot_dimension_numbers<[1], [0], [0], [1], [0, 0, 1, 1], [], []>} : vector<8x32xbf16>, vector<32x8xbf16>, vector<8x8xf32> -> vector<8x8xf32>
    %25 = vector.extract_strided_slice %22 {offsets = [0, 0], sizes = [1, 8], strides = [1, 1]} : vector<1x16xf32> to vector<1x8xf32>
    %26 = vector.broadcast %25 : vector<1x8xf32> to vector<8x8xf32>
    %27 = arith.addf %24, %26 : vector<8x8xf32>
    %28 = vector.extract_strided_slice %20 {offsets = [0, 8], sizes = [32, 8], strides = [1, 1]} : vector<32x16xbf16> to vector<32x8xbf16>
    %cst_22 = arith.constant dense<0.000000e+00> : vector<8x8xf32>
    %29 = tpu.matmul %18, %28, %cst_22 {dimension_numbers = #tpu.dot_dimension_numbers<[1], [0], [0], [1], [0, 0, 1, 1], [], []>} : vector<8x32xbf16>, vector<32x8xbf16>, vector<8x8xf32> -> vector<8x8xf32>
    %30 = vector.extract_strided_slice %22 {offsets = [0, 8], sizes = [1, 8], strides = [1, 1]} : vector<1x16xf32> to vector<1x8xf32>
    %31 = vector.broadcast %30 : vector<1x8xf32> to vector<8x8xf32>
    %32 = arith.addf %29, %31 : vector<8x8xf32>
    %33 = arith.truncf %27 : vector<8x8xf32> to vector<8x8xbf16>
    %34 = arith.truncf %32 : vector<8x8xf32> to vector<8x8xbf16>
    "tpu.trace_start"() <{level = 10 : i32, message = "qd,kd->qk"}> : () -> ()
    %cst_23 = arith.constant dense<0.000000e+00> : vector<8x8xf32>
    %35 = tpu.matmul %12, %33, %cst_23 {dimension_numbers = #tpu.dot_dimension_numbers<[1], [1], [0], [0], [0, 0, 1, 0], [], []>} : vector<8x8xbf16>, vector<8x8xbf16>, vector<8x8xf32> -> vector<8x8xf32>
    "tpu.trace_stop"() : () -> ()
    %cst_24 = arith.constant dense<0xFF800000> : vector<8xf32>
    %36 = vector.multi_reduction <maximumf>, %35, %cst_24 [1] : vector<8x8xf32> to vector<8xf32>
    %37 = vector.shape_cast %36 : vector<8xf32> to vector<8x1xf32>
    %38 = vector.broadcast %37 : vector<8x1xf32> to vector<8x8xf32>
    %39 = arith.subf %35, %38 : vector<8x8xf32>
    %40 = math.exp %39 : vector<8x8xf32>
    %cst_25 = arith.constant dense<0.000000e+00> : vector<8xf32>
    %41 = vector.multi_reduction <add>, %40, %cst_25 [1] : vector<8x8xf32> to vector<8xf32>
    %42 = vector.shape_cast %41 : vector<8xf32> to vector<8x1xf32>
    %43 = vector.broadcast %42 : vector<8x1xf32> to vector<8x8xf32>
    %44 = arith.divf %40, %43 : vector<8x8xf32>
    %c0_26 = arith.constant 0 : index
    %c0_27 = arith.constant 0 : index
    %c0_28 = arith.constant 0 : index
    %c0_29 = arith.constant 0 : index
    %45 = vector.load %arg13[%c0_26, %c0_27, %c0_28, %c0_29] : memref<1x1x8x8xf32, #tpu.memory_space<vmem>>, vector<1x1x8x8xf32>
    %46 = vector.shape_cast %45 : vector<1x1x8x8xf32> to vector<8x8xf32>
    %47 = vector.shape_cast %44 : vector<8x8xf32> to vector<1x1x8x8xf32>
    tpu.vector_store %arg13[%c0_26, %c0_27, %c0_28, %c0_29], %47 {strides = array<i32>} : memref<1x1x8x8xf32, #tpu.memory_space<vmem>>, vector<1x1x8x8xf32>,
    %48 = arith.truncf %44 : vector<8x8xf32> to vector<8x8xbf16>
    %cst_30 = arith.constant dense<0.000000e+00> : vector<8x8xf32>
    %49 = tpu.matmul %48, %34, %cst_30 {dimension_numbers = #tpu.dot_dimension_numbers<[1], [0], [0], [1], [0, 0, 1, 1], [], []>} : vector<8x8xbf16>, vector<8x8xbf16>, vector<8x8xf32> -> vector<8x8xf32>
    %50 = arith.truncf %49 : vector<8x8xf32> to vector<8x8xbf16>
    %c0_31 = arith.constant 0 : index
    %c0_32 = arith.constant 0 : index
    %c0_33 = arith.constant 0 : index
    %51 = vector.load %arg10[%c0_31, %c0_32, %c0_33] : memref<1x8x32xbf16, #tpu.memory_space<vmem>>, vector<1x8x32xbf16>
    %52 = vector.shape_cast %51 : vector<1x8x32xbf16> to vector<8x32xbf16>
    %cst_34 = arith.constant dense<0.000000e+00> : vector<8x32xf32>
    %53 = tpu.matmul %50, %52, %cst_34 {dimension_numbers = #tpu.dot_dimension_numbers<[1], [0], [0], [1], [0, 0, 1, 1], [], []>} : vector<8x8xbf16>, vector<8x32xbf16>, vector<8x32xf32> -> vector<8x32xf32>
    %c0_i32 = arith.constant 0 : i32
    %54 = arith.cmpi eq, %arg2, %c0_i32 : i32
    %55 = arith.extui %54 : i1 to i32
    %c0_i32_35 = arith.constant 0 : i32
    %56 = arith.cmpi ne, %55, %c0_i32_35 : i32
    scf.if %56 {
      %cst_41 = arith.constant 0.000000e+00 : f32
      %63 = vector.broadcast %cst_41 : f32 to vector<8x32xf32>
      %c0_42 = arith.constant 0 : index
      %c0_43 = arith.constant 0 : index
      %64 = vector.load %arg14[%c0_42, %c0_43] : memref<8x32xf32, #tpu.memory_space<vmem>>, vector<8x32xf32>
      tpu.vector_store %arg14[%c0_42, %c0_43], %63 {strides = array<i32>} : memref<8x32xf32, #tpu.memory_space<vmem>>, vector<8x32xf32>,
    } else {
    }
    %c0_36 = arith.constant 0 : index
    %c0_37 = arith.constant 0 : index
    %57 = vector.load %arg14[%c0_36, %c0_37] : memref<8x32xf32, #tpu.memory_space<vmem>>, vector<8x32xf32>
    %58 = arith.addf %57, %53 : vector<8x32xf32>
    %c0_38 = arith.constant 0 : index
    %c0_39 = arith.constant 0 : index
    %59 = vector.load %arg14[%c0_38, %c0_39] : memref<8x32xf32, #tpu.memory_space<vmem>>, vector<8x32xf32>
    tpu.vector_store %arg14[%c0_38, %c0_39], %58 {strides = array<i32>} : memref<8x32xf32, #tpu.memory_space<vmem>>, vector<8x32xf32>,
    %c3_i32 = arith.constant 3 : i32
    %60 = arith.cmpi eq, %arg2, %c3_i32 : i32
    %61 = arith.extui %60 : i1 to i32
    %c0_i32_40 = arith.constant 0 : i32
    %62 = arith.cmpi ne, %61, %c0_i32_40 : i32
    scf.if %62 {
      %c0_41 = arith.constant 0 : index
      %c0_42 = arith.constant 0 : index
      %63 = vector.load %arg14[%c0_41, %c0_42] : memref<8x32xf32, #tpu.memory_space<vmem>>, vector<8x32xf32>
      %c0_43 = arith.constant 0 : index
      %c0_44 = arith.constant 0 : index
      %64 = vector.load %arg11[%c0_43, %c0_44] : memref<1x32xf32, #tpu.memory_space<vmem>>, vector<1x32xf32>
      %65 = vector.broadcast %64 : vector<1x32xf32> to vector<8x32xf32>
      %66 = arith.addf %63, %65 : vector<8x32xf32>
      %c0_45 = arith.constant 0 : index
      %c0_46 = arith.constant 0 : index
      %c0_47 = arith.constant 0 : index
      %67 = vector.load %arg12[%c0_45, %c0_46, %c0_47] : memref<1x8x32xf32, #tpu.memory_space<vmem>>, vector<1x8x32xf32>
      %68 = vector.shape_cast %67 : vector<1x8x32xf32> to vector<8x32xf32>
      %69 = vector.shape_cast %66 : vector<8x32xf32> to vector<1x8x32xf32>
      tpu.vector_store %arg12[%c0_45, %c0_46, %c0_47], %69 {strides = array<i32>} : memref<1x8x32xf32, #tpu.memory_space<vmem>>, vector<1x8x32xf32>,
    } else {
    }
    return
  }
  func.func @transform_0(%arg0: i32, %arg1: i32, %arg2: i32) -> (i32, i32, i32) {
    %c0_i32 = arith.constant 0 : i32
    %c0_i32_0 = arith.constant 0 : i32
    return %arg0, %arg1, %c0_i32 : i32, i32, i32
  }
  func.func @transform_1(%arg0: i32, %arg1: i32, %arg2: i32) -> (i32, i32, i32) {
    %c0_i32 = arith.constant 0 : i32
    %c0_i32_0 = arith.constant 0 : i32
    %c0_i32_1 = arith.constant 0 : i32
    return %arg0, %c0_i32, %c0_i32_0 : i32, i32, i32
  }
  func.func @transform_2(%arg0: i32, %arg1: i32, %arg2: i32) -> (i32, i32, i32) {
    %c0_i32 = arith.constant 0 : i32
    %c0_i32_0 = arith.constant 0 : i32
    %c0_i32_1 = arith.constant 0 : i32
    return %arg0, %c0_i32, %c0_i32_0 : i32, i32, i32
  }
  func.func @transform_3(%arg0: i32, %arg1: i32, %arg2: i32) -> (i32, i32, i32) {
    %c0_i32 = arith.constant 0 : i32
    %c0_i32_0 = arith.constant 0 : i32
    %c0_i32_1 = arith.constant 0 : i32
    return %arg2, %c0_i32, %c0_i32_0 : i32, i32, i32
  }
  func.func @transform_4(%arg0: i32, %arg1: i32, %arg2: i32) -> (i32, i32, i32) {
    %c0_i32 = arith.constant 0 : i32
    %c0_i32_0 = arith.constant 0 : i32
    %c0_i32_1 = arith.constant 0 : i32
    return %arg2, %c0_i32, %c0_i32_0 : i32, i32, i32
  }
  func.func @transform_5(%arg0: i32, %arg1: i32, %arg2: i32) -> (i32, i32, i32) {
    %c0_i32 = arith.constant 0 : i32
    %c0_i32_0 = arith.constant 0 : i32
    %c0_i32_1 = arith.constant 0 : i32
    return %arg2, %c0_i32, %c0_i32_0 : i32, i32, i32
  }
  func.func @transform_6(%arg0: i32, %arg1: i32, %arg2: i32) -> (i32, i32, i32) {
    %c0_i32 = arith.constant 0 : i32
    %c0_i32_0 = arith.constant 0 : i32
    %c0_i32_1 = arith.constant 0 : i32
    return %arg2, %c0_i32, %c0_i32_0 : i32, i32, i32
  }
  func.func @transform_7(%arg0: i32, %arg1: i32, %arg2: i32) -> (i32, i32, i32) {
    %c0_i32 = arith.constant 0 : i32
    %c0_i32_0 = arith.constant 0 : i32
    %c0_i32_1 = arith.constant 0 : i32
    return %arg2, %c0_i32, %c0_i32_0 : i32, i32, i32
  }
  func.func @transform_8(%arg0: i32, %arg1: i32, %arg2: i32) -> (i32, i32) {
    %c0_i32 = arith.constant 0 : i32
    %c0_i32_0 = arith.constant 0 : i32
    %c0_i32_1 = arith.constant 0 : i32
    return %c0_i32, %c0_i32_0 : i32, i32
  }
  func.func @transform_9(%arg0: i32, %arg1: i32, %arg2: i32) -> (i32, i32, i32) {
    %c0_i32 = arith.constant 0 : i32
    %c0_i32_0 = arith.constant 0 : i32
    return %arg0, %arg1, %c0_i32 : i32, i32, i32
  }
  func.func @transform_10(%arg0: i32, %arg1: i32, %arg2: i32) -> (i32, i32, i32, i32) {
    %c0_i32 = arith.constant 0 : i32
    %c0_i32_0 = arith.constant 0 : i32
    return %arg0, %arg2, %arg1, %c0_i32 : i32, i32, i32, i32
  }
}

</mosaic_0001>

<bundles_post_ra>
// kernel: tpu_custom_call.1
= control target key start
LH: loop header
LB: loop body
LE: loop exit
PB: predicated region body
PF: predicated region fallthrough
CT: control target
= control target key end

     0   :  { %s1843_s0 = inlined_call_operand.vmem [shape: f32[2,8,32], index: 0, kind: input, shape index: {}]   ;;  %s1844_s1 = inlined_call_operand.vmem [shape: f32[2,8,32], index: 1, kind: input, shape index: {}]   ;;  %s1845_s2 = inlined_call_operand.vmem [shape: f32[2,8,32], index: 2, kind: input, shape index: {}]   ;;  %s1846_s3 = inlined_call_operand.vmem [shape: bf16[4,32,8], index: 3, kind: input, shape index: {}]   ;;  %s1847_s4 = inlined_call_operand.vmem [shape: f32[4,1,8], index: 4, kind: input, shape index: {}]   ;;  %s1848_s5 = inlined_call_operand.vmem [shape: bf16[4,32,16], index: 5, kind: input, shape index: {}]   ;;  %s1849_s6 = inlined_call_operand.vmem [shape: f32[4,1,16], index: 6, kind: input, shape index: {}]   ;;  %s1850_s7 = inlined_call_operand.vmem [shape: bf16[4,8,32], index: 7, kind: input, shape index: {}]   ;;  %s1851_s8 = inlined_call_operand.vmem [shape: f32[1,32], index: 8, kind: input, shape index: {}]   ;;  %s1852_s9 = inlined_call_operand.hbm [shape: f32[2,8,32], index: 9, kind: output, shape index: {0}]   ;;  %s1853_s10 = inlined_call_operand.hbm [shape: f32[2,4,8,8], index: 10, kind: output, shape index: {1}]  }
   0x1   :  { %1868 = sst [smem:[#allocation19_spill]] %s1843_s0 }
   0x2   :  { %1869 = sst [smem:[#allocation20_spill]] %s1844_s1 }
   0x3   :  { %1870 = sst [smem:[#allocation21_spill]] %s1845_s2 }
   0x4   :  { %1871 = sst [smem:[#allocation22_spill]] %s1846_s3 }
   0x5   :  { %1872 = sst [smem:[#allocation23_spill]] %s1852_s9 }
   0x6   :  { %1873 = sst [smem:[#allocation24_spill]] %s1853_s10 }
   0x7   :  { %16 = vsyncpa [#allocation4], 0 }
   0x8   :  { %18 = vsyncpa [#allocation4 + $0x1], 0 }
   0x9   :  { %19 = vsyncpa [#allocation6], 0 }
   0xa   :  { %21 = vsyncpa [#allocation6 + $0x1], 0  ;;  %s1541_s13 = smov 0   ;;  %s1543_s14 = smov 0  }
   0xb   :  { %s1545_s15 = smov 0   ;;  %s1547_s16 = smov 0  }
   0xc   :  { %s1549_s17 = smov 0   ;;  %s1551_s18 = smov 0  }
   0xd   :  { %s1553_s19 = smov 0   ;;  %s1555_s20 = smov 0  }
   0xe   :  { %s1557_s21 = smov 0   ;;  %s1559_s22 = smov 0  }
   0xf   :  { %s1561_s23 = smov 0  }
  0x10 LB: > { %1874 = sst [smem:[#allocation9_spill]] %s1446_s15  ;;  %s1120_s24 = sadd.s32 4294967295, %s1478_s23   ;;  %s1478_s23 = sphi %s1561_s23, %s27_s23   ;;  %s1474_s22 = sphi %s1559_s22, %s1910_s22   ;;  %s1470_s21 = sphi %s1557_s21, %s1909_s21   ;;  %s1466_s20 = sphi %s1555_s20, %s1908_s20   ;;  %s1462_s19 = sphi %s1553_s19, %s1907_s19   ;;  %s1458_s18 = sphi %s1551_s18, %s1906_s18   ;;  %s1454_s17 = sphi %s1549_s17, %s1914_s17   ;;  %s1450_s16 = sphi %s1547_s16, %s1913_s16   ;;  %s1446_s15 = sphi %s1545_s15, %s1904_s15   ;;  %s1442_s14 = sphi %s1543_s14, %s1912_s14   ;;  %s1438_s13 = sphi %s1541_s13, %s1911_s13  }
  0x11   : > { %1875 = sst [smem:[#allocation10_spill]] %s1450_s16  ;;  %s1121_s25 = sadd.s32 4294967294, %s1478_s23  }
  0x12   : > { %1876 = sst [smem:[#allocation11_spill]] %s1458_s18  ;;  %s39_s26 = sadd.s32 1, %s1470_s21 }
  0x13   : > { %1877 = sst [smem:[#allocation12_spill]] %s1470_s21  ;;  %s46_s27 = sadd.s32 1, %s1474_s22 }
  0x14   : > { %1878 = sst [smem:[#allocation13_spill]] %s1474_s22  ;;  %p40_p0 = scmp.ge.s32.totalorder %s39_s26, 4 }
  0x15   : > { %s286_s28 = sadd.s32 1, %s1458_s18  ;;  %p296_p1 = scmp.ne.s32.totalorder %s1458_s18, %s1454_s17 }
  0x16   : > { %p1603_p2 = scmp.eq.s32.totalorder %s1120_s24, 7  ;;  %s1916_s26 = smov (%p40_p0, %s39_s26), 0 }
  0x17   : > { %1880 = sst [smem:[#allocation14_spill]] %s1916_s26  ;;  %s1918_s27 = smov (!%p40_p0, %s46_s27), %s1474_s22 }
  0x18   : > { %p1612_p3 = por %p1603_p2, %p296_p1  ;;  %p302_p4 = scmp.ne.s32.totalorder %s1454_s17, %s1450_s16 }
  0x19   : > { %p48_p5 = scmp.ge.s32.totalorder %s1918_s27, 2  ;;  %p1618_p6 = scmp.eq.s32.totalorder %s1121_s25, 7 }
  0x1a   : > { %s1881_s30 = scalar_select %p1612_p3, 1, 0 }
  0x1b   : > { %s310_s12 = ssub.s32 %s1470_s21, %s1916_s26  ;;  %s316_s24 = sadd.s32 1, %s1446_s15 }
  0x1c   : > { %1882 = sst [smem:[#allocation15_spill]] %s1881_s30  ;;  %s1920_s27 = smov (%p48_p5, %s1918_s27), 0 }
  0x1d   : > { %1884 = sst [smem:[#allocation16_spill]] %s1920_s27  ;;  %p1629_p7 = por %p1618_p6, %p302_p4 }
  0x1e   : > { %p326_p8 = scmp.ne.s32.totalorder %s1446_s15, %s1442_s14  ;;  %s281_s16 = ssub.s32 %s1474_s22, %s1920_s27 }
  0x1f   : > { %p332_p9 = scmp.ne.s32.totalorder %s1442_s14, %s1438_s13  ;;  %p284_p10 = scmp.eq.s32.totalorder %s281_s16, 0 }
  0x20   : > { %s311_s25 = sor.u32 %s310_s12, %s281_s16  ;;  %p1641_p12 = por %p326_p8, %p1603_p2 }
  0x21   : > { %p314_p11 = scmp.eq.s32.totalorder %s311_s25, 0  ;;  %p1653_p13 = por %p332_p9, %p1618_p6 }
  0x22   : > { %s1646_s26 = scalar_select %p284_p10, %s1458_s18, %s286_s28  }
  0x23   : > { %s1649_s21 = scalar_select %p314_p11, %s1446_s15, %s316_s24  }
  0x24   : > { %1887 = sst [smem:[#allocation17_spill]] %s1646_s26  ;;  %p1124_p0 = scmp.ge.s32.totalorder %s1478_s23, 1 }
  0x25   : > { %1888 = sst [smem:[#allocation18_spill]] %s1649_s21  ;;  %p413_p1 = scmp.lt.s32.totalorder %s1478_s23, 9 }
  0x26   : > { %s1889_s30 = scalar_select %p1653_p13, 1, 0 }
  0x27   : > { %p414_p4 = pnand %p1124_p0, %p413_p1 }
  0x28   : > { %p501_p2 = scmp.lt.s32.totalorder (!%p414_p4), %s1462_s19, 3  ;;  %s1861_s16 = sand.u32 (!%p414_p4), 1, %s1454_s17   ;;  %v1480_v0 = vmov (!%p414_p4), 0.0   ;;  %vm1481_vm0 = vmmov (!%p414_p4), 0   ;;  %vm547_vm1 = vcmask (!%p414_p4), 261120   ;;  %vm717_vm2 = vcmask (!%p414_p4), 64512  }
  0x29   : > { %417 = sbr.rel (%p414_p4) target bundleno = 1310 (0x51e), region = 56  ;;  %1182 = vmatprep.subr.bf16.mxu1 (!%p414_p4), %v1480_v0  ;;  %s1664_s28 = sshll.u32 (!%p414_p4), %s1861_s16, 3  ;;  %1174 = vmatprep.subr.bf16.mxu0 (!%p414_p4), %v1480_v0  ;;  %vm780_vm3 = vcmask (!%p414_p4), 1043456  }
  0x2a   : > { %p486_p5 = scmp.lt.s32.totalorder (!%p414_p4), %s1466_s20, 1  ;;  %1186 = vmatprep.mubr.msk.bf16.mxu1 (!%p414_p4), %vm1481_vm0, %v1480_v0  ;;  %1178 = vmatprep.mubr.msk.bf16.mxu0 (!%p414_p4), %vm1481_vm0, %v1480_v0  ;;  %s1890_s3 = sld [smem:[#allocation22_spill]] (!%p414_p4) }
  0x2b   : > { %s1891_s1 = sld [smem:[#allocation20_spill]] (!%p414_p4)  ;;  %s1892_s0 = sld [smem:[#allocation19_spill]] (!%p414_p4) }
  0x2c   : > { %s1482_s15 = smov (!%p414_p4), 120   ;;  %s1893_s2 = sld [smem:[#allocation21_spill]] (!%p414_p4) }
  0x2d   : > { %p1147_p6 = scmp.ne.s32.totalorder (!%p414_p4), %s1462_s19, 0 }
  0x30   : > { %s1669_s29 = scalar_select %p501_p2, %s1462_s19, 3 }
  0x31   : > { %s487_s26 = scalar_select %p486_p5, %s1466_s20, 1 }
  0x32   : > { %s1157_s11 = sshll.u32 %s1669_s29, 4  ;;  %v1483_v62 = vmov (!%p1147_p6), 0.0  }
  0x33   : > { %s513_s25 = scalar_lea.vmem %s1848_s5, %s1157_s11  ;;  %s505_s22 = scalar_lea.vmem %s1890_s3, %s1157_s11  ;;  %876 = vst.msk [vmem:[#allocation2] sm:$0xff] (!%p1147_p6), %vm547_vm1, %v1483_v62 }
  0x34   : > { %v1320_v1 = vld [vmem:[%s513_s25] sm:$0xff]   ;;  %v1322_v3 = vld [vmem:[%s513_s25 + $0x8] sm:$0xff]   ;;  %s1683_s18 = sshll.u32 %s487_s26, 3  ;;  %s516_s26 = scalar_lea.vmem %s1849_s6, %s1669_s29 }
  0x35   : > { %v1321_v2 = vld [vmem:[%s505_s22] sm:$0xff]   ;;  %1183 = vmatpush3.bf16.msra.mxu1 %v1320_v1  ;;  %s496_s12 = scalar_lea.vmem %s1891_s1, %s1683_s18  ;;  %v1323_v4 = vld [vmem:[%s505_s22 + $0x8] sm:$0xff]   ;;  %s492_s16 = scalar_lea.vmem %s1892_s0, %s1683_s18  ;;  %663 = vrot.lane.b32.xlu0 %v1320_v1, %s1482_s15 }
  0x36   : > { %1184 = vmatprep.subr.bf16.mxu1 %v1480_v0  ;;  %1175 = vmatpush3.bf16.msra.mxu0 %v1321_v2  ;;  %v593_v5 = vld [vmem:[%s496_s12] sm:$0xff]  ;;  %s508_s12 = scalar_lea.vmem %s1847_s4, %s1669_s29 }
  0x37   : > { %1176 = vmatprep.subr.bf16.mxu0 %v1480_v0  ;;  %v522_v6 = vld [vmem:[%s492_s16] sm:$0xff]  ;;  %v594_v7 = vpack.c.bf16 %v593_v5, %v593_v5  ;;  %s500_s16 = scalar_lea.vmem %s1893_s2, %s1683_s18  ;;  %s1134_s18 = sshll.u32 %s1669_s29, 2 }
  0x38   : > { %v523_v8 = vpack.c.bf16 %v522_v6, %v522_v6  ;;  %v1139_v9 = vld [vmem:[%s516_s26] ss:$0 sm:$0xff]  ;;  %s520_s22 = scalar_lea.vmem %s1850_s7, %s1134_s18  ;;  %s1866_s26 = sand.u32 1, %s1442_s14  }
  0x39   : > { %1185 = vmatpush3.bf16.msra.mxu1 %v1322_v3  ;;  %665 = vrot.lane.b32.xlu0 %v1322_v3, %s1482_s15  ;;  %v1135_v10 = vld [vmem:[%s508_s12] ss:$0 sm:$0xff]  ;;  %s1734_s11 = sshll.u32 %s1866_s26, 3  ;;  %s478_s29 = scalar_lea.vmem [#allocation3], %s1664_s28 }
  0x3a   : > { %1177 = vmatpush3.bf16.msra.mxu0 %v1323_v4  ;;  %1198 = vmatprep.subr.bf16.mxu1 %v1480_v0  ;;  %v595_v26 = vld [vmem:[%s500_s16] sm:$0xff]  ;;  %s1867_s25 = scalar_lea.vmem [#allocation5], %s1734_s11 }
  0x3b   : > { %1190 = vmatprep.subr.bf16.mxu0 %v1480_v0  ;;  %v596_v28 = vpack.c.bf16 %v595_v26, %v595_v26  ;;  %v825_v47 = vld [vmem:[%s520_s22] sm:$0xf] }
  0x3c   : > { %1187 = vmatmul.mubr.msk.bf16.vlgmr.msra.gmra.mrb[0].mxu1 %vm547_vm1, %v594_v7  ;;  %v830_v48 = vsel %vm780_vm3, %v825_v47, 0 }
  0x3d   : > { %1179 = vmatmul.mubr.msk.bf16.vlgmr.msra.gmra.mrb[0].mxu0 %vm547_vm1, %v523_v8  ;;  %1200 = vmatprep.mubr.msk.bf16.mxu1 %vm1481_vm0, %v1480_v0 }
  0x3e   : > { %1194 = vmatprep.mubr.msk.bf16.mxu0 %vm1481_vm0, %v1480_v0  ;;  %669 = vrot.lane.b32.xlu0 %v1139_v9, %s1482_s15 }
  0xa7   : > { %v664_v25 = vpop.permute.xlu0 %663 }
  0xa8   : > { %1191 = vmatpush3.bf16.msra.mxu0 %v664_v25 }
  0xa9   : > { %1192 = vmatprep.subr.bf16.mxu0 %v1480_v0 }
  0xab   : > { %v666_v27 = vpop.permute.xlu0 %665 }
  0xac   : > { %1193 = vmatpush3.bf16.msra.mxu0 %v666_v27 }
  0xad   : > { %1204 = vmatprep.subr.bf16.mxu0 %v1480_v0 }
  0xaf   : > { %1195 = vmatmul.mubr.msk.bf16.vlgmr.msra.gmra.mrb[4].mxu0 %vm547_vm1, %v596_v28 }
  0xb0   : > { %1206 = vmatprep.mubr.msk.bf16.mxu0 %vm1481_vm0, %v1480_v0  ;;  %v670_v42 = vpop.permute.xlu0 %669 }
 0x10f   : > { %v657_v11 = vpop.f32.mrb[0].mxu1 }
 0x110   : > { %v658_v12 = vadd.f32 %v1139_v9, %v657_v11  ;;  %v1188_v13 = vpop.f32.mrb[1].mxu1  ;;  %v585_v14 = vpop.f32.mrb[0].mxu0 }
 0x111   : > { %v660_v15 = vpop.f32.mrb[2].mxu1  ;;  %v586_v16 = vadd.f32 %v1135_v10, %v585_v14  ;;  %v1180_v17 = vpop.f32.mrb[1].mxu0 }
 0x112   : > { %v715_v18 = vpack.c.bf16 %v658_v12, %v658_v12  ;;  %v1189_v19 = vpop.f32.mrb[3].mxu1  ;;  %v588_v20 = vpop.f32.mrb[2].mxu0 }
 0x113   : > { %v1181_v21 = vpop.f32.mrb[3].mxu0  ;;  %v591_v23 = vmul.f32 0.35355338, %v586_v16 }
 0x114   : > { %v722_v22 = vsel %vm717_vm2, %v715_v18, 0 }
 0x115   : > { %1199 = vmatpush3.bf16.xpose.msra.mxu1 %v722_v22  ;;  %v592_v24 = vpack.c.bf16 %v591_v23, %v591_v23 }
 0x116   : > { %1210 = vmatprep.subr.bf16.mxu1 %v1480_v0 }
 0x11c   : > { %1201 = vmatmul.mubr.msk.bf16.vlgmr.msra.gmra.mrb[4].mxu1 %vm717_vm2, %v592_v24 }
 0x11d   : > { %1212 = vmatprep.mubr.msk.bf16.mxu1 %vm1481_vm0, %v1480_v0  ;;  %1211 = vmatpush3.bf16.msra.mxu1 %v830_v48 }
 0x182   : > { %v709_v39 = vpop.f32.mrb[4].mxu0 }
 0x183   : > { %v1196_v40 = vpop.f32.mrb[5].mxu0  ;;  %v710_v44 = vadd.f32 %v709_v39, %v670_v42 }
 0x184   : > { %v712_v41 = vpop.f32.mrb[6].mxu0 }
 0x185   : > { %v1197_v43 = vpop.f32.mrb[7].mxu0  ;;  %v716_v45 = vpack.c.bf16 %v710_v44, %v710_v44 }
 0x187   : > { %v782_v46 = vsel %vm780_vm3, %v716_v45, 0 }
 0x188   : > { %1205 = vmatpush3.bf16.msra.mxu0 %v782_v46 }
 0x1ef   : > { %v758_v29 = vpop.f32.mrb[4].mxu1 }
 0x1f0   : > { %v1202_v30 = vpop.f32.mrb[5].mxu1  ;;  %v764_v31 = vsel %vm717_vm2, %v758_v29, -inf }
 0x1f1   : > { %765 = vmax.xlane.f32.xlu1 %v764_v31  ;;  %v761_v32 = vpop.f32.mrb[6].mxu1 }
 0x1f2   : > { %v1203_v33 = vpop.f32.mrb[7].mxu1 }
 0x27e   : > { %v766_v34 = vpop.xlane.xlu1 %765 }
 0x27f   : > { %v767_v35 = vsub.f32 %v758_v29, %v766_v34 }
 0x281   : > { %v768_v36 = vmul.f32 1.442695, %v767_v35 }
 0x283   : > { %1324 = vpow2.f32 %v768_v36 }
 0x28d   : > { %v1325_v37 = vpop.eup %1324 }
 0x28e   : > { %v770_v38 = vsel %vm717_vm2, %v1325_v37, 0.0 }
 0x28f   : > { %771 = vadd.xlane.f32.xlu1 %v770_v38 }
 0x31c   : > { %v772_v49 = vpop.xlane.xlu1 %771 }
 0x31d   : > { %1326 = vrcp.f32 %v772_v49 }
 0x327   : > { %v1327_v50 = vpop.eup %1326 }
 0x328   : > { %v774_v51 = vmul.f32 %v1327_v50, %v1325_v37 }
 0x32a   : > { %775 = vst.msk [vmem:[%s1867_s25] sm:$0xff] %vm717_vm2, %v774_v51  ;;  %v776_v52 = vpack.c.bf16 %v774_v51, %v774_v51 }
 0x32c   : > { %1207 = vmatmul.mubr.msk.bf16.vlgmr.msra.gmra.mrb[8].mxu0 %vm717_vm2, %v776_v52 }
 0x3ff   : > { %v818_v53 = vpop.f32.mrb[8].mxu0 }
 0x400   : > { %v824_v54 = vpack.c.bf16 %v818_v53, %v818_v53  ;;  %v1208_v55 = vpop.f32.mrb[9].mxu0 }
 0x401   : > { %v821_v56 = vpop.f32.mrb[10].mxu0 }
 0x402   : > { %v1209_v57 = vpop.f32.mrb[11].mxu0  ;;  %1213 = vmatmul.mubr.msk.bf16.vlgmr.msra.gmra.mrb[8].mxu1 %vm717_vm2, %v824_v54 }
 0x4d2   : > { %875 = sbr.rel (%p1147_p6) target bundleno = 1241 (0x4d9), region = 60 }
 0x4d5   : > { %v866_v58 = vpop.f32.mrb[8].mxu1 }
 0x4d6   : > { %v1214_v59 = vpop.f32.mrb[9].mxu1 }
 0x4d7   : > { %v869_v60 = vpop.f32.mrb[10].mxu1 }
 0x4d8   : > { %v1215_v61 = vpop.f32.mrb[11].mxu1 }
 0x4d9 PF: > { %v877_v63 = vld [vmem:[#allocation2] sm:$0xff]  ;;  %p1148_p8 = scmp.ne.s32.totalorder %s1462_s19, 3 }
 0x4da   : > { %v878_v0 = vadd.f32 %v877_v63, %v866_v58  ;;  %v1149_v2 = vld [vmem:[%s1851_s8] ss:$0 sm:$0xff] (!%p1148_p8) }
 0x4db   : > { %883 = sbr.rel (%p1148_p8) target bundleno = 1255 (0x4e7), region = 64 }
 0x4dc   : > { %879 = vst.msk [vmem:[#allocation2] sm:$0xff] %vm547_vm1, %v878_v0 }
 0x4e3   : > { %v884_v1 = vld [vmem:[#allocation2] sm:$0xff] }
 0x4e4   : > { %v892_v3 = vadd.f32 %v1149_v2, %v884_v1 }
 0x4e6   : > { %893 = vst.msk [vmem:[%s478_s29] sm:$0xff] %vm547_vm1, %v892_v3 }
 0x4e7 PF: > { %s1152_s27 = sshll.u32 %s1466_s20, 7  ;;  %s1895_s15 = sld [smem:[#allocation23_spill]] }
 0x4e8   : > { %s914_s22 = sshll.u32 %s478_s29, 4  ;;  %s1897_s25 = sand.u32 1, %s1454_s17   ;;  %s915_s22 = int_to_ptr.vmem [resolvable:$true] %s914_s22 }
 0x4e9   : > { %s895_s0 = scalar_lea.sflag [#allocation4], %s1897_s25  ;;  %s1328_s1 = scalar_lea.vmem %s915_s22, 128 }
 0x4ea   : > { %p1329_p9 = scmp.ne.s32.totalorder %s915_s22, %s1328_s1  ;;  %s1484_s12 = smov [#allocation3]  }
 0x4eb   : > { %s1332_s24 = sshll.u32 %s1484_s12, 4  ;;  %s1333_s24 = int_to_ptr.vmem [resolvable:$false] %s1332_s24 }
 0x4ec   : > { %p1330_p10 = pnand %p1329_p9, %p1612_p3  ;;  %s1334_s2 = scalar_lea.vmem %s1333_s24, 256 }
 0x4ed   : > { %s1896_s26 = smov %s1895_s15  ;;  %s1755_s21 = scalar_lea.hbm %s1895_s15, %s1152_s27 }
 0x4ee   : > { %p1331_p11 = pneg %p1330_p10  ;;  %p1335_p0 = scmp.lt.s32.totalorder %s915_s22, %s1333_s24 }
 0x4ef   : > { %p1336_p1 = scmp.lt.s32.totalorder %s1334_s2, %s1328_s1 }
 0x4f1   : > { %p1337_p4 = por %p1336_p1, %p1335_p0 }
 0x4f3   : > { %p1338_p2 = pnand %p1337_p4, %p1331_p11 }
 0x4f5   : > { %1341 = shalt.err (!%p1338_p2)
}
 0x4f6   : > { %s1342_s25 = scalar_lea.hbm %s1755_s21, 128  ;;  %s1346_s16 = scalar_lea.hbm %s1896_s26, 256 }
 0x4f7   : > { %p1343_p5 = scmp.ne.s32.totalorder %s1755_s21, %s1342_s25  ;;  %p1347_p9 = scmp.lt.u32.totalorder %s1755_s21, %s1896_s26 }
 0x4f8   : > { %p1348_p10 = scmp.lt.u32.totalorder %s1346_s16, %s1342_s25  ;;  %p1350_p0 = scmp.lt.u32.totalorder %s1342_s25, %s1755_s21 }
 0x4f9   : > { %p1344_p6 = pnand %p1343_p5, %p1612_p3 }
 0x4fa   : > { %p1349_p11 = por %p1348_p10, %p1347_p9 }
 0x4fb   : > { %p1345_p8 = pneg %p1344_p6 }
 0x4fc   : > { %p1351_p1 = por %p1350_p0, %p1349_p11 }
 0x4fe   : > { %p1352_p4 = pnand %p1351_p1, %p1345_p8 }
 0x500   : > { %1355 = shalt.err (!%p1352_p4)
}
 0x501   : > { %1216 = dma.vmem_to_hbm [thread:$0]  (%p1612_p3), %s915_s22, 128, %s1755_s21, %s895_s0  }
 0x502   : > { %s1153_s1 = sshll.u32 %s1466_s20, 2  ;;  %s1898_s2 = scalar_lea.vmem [#allocation5], %s1734_s11 }
 0x503   : > { %s930_s12 = sshll.u32 %s1898_s2, 4  ;;  %s926_s24 = sadd.s32 %s1462_s19, %s1153_s1  ;;  %s1780_s12 = int_to_ptr.vmem [resolvable:$true] %s930_s12 }
 0x504   : > { %s1154_s25 = sshll.u32 %s926_s24, 7  ;;  %s1899_s28 = sld [smem:[#allocation24_spill]] }
 0x505   : > { %s1900_s18 = sand.u32 1, %s1442_s14   ;;  %s1356_s3 = scalar_lea.vmem %s1780_s12, 128 }
 0x506   : > { %s900_s15 = scalar_lea.sflag [#allocation6], %s1900_s18  ;;  %p1357_p2 = scmp.ne.s32.totalorder %s1780_s12, %s1356_s3 }
 0x507   : > { %s1485_s0 = smov [#allocation5]  }
 0x508   : > { %p1358_p3 = pnand %p1357_p2, %p1641_p12  ;;  %s1360_s20 = sshll.u32 %s1485_s0, 4  ;;  %s1361_s20 = int_to_ptr.vmem [resolvable:$false] %s1360_s20 }
 0x509   : > { %s1362_s19 = scalar_lea.vmem %s1361_s20, 256  ;;  %p1363_p6 = scmp.lt.s32.totalorder %s1780_s12, %s1361_s20 }
 0x50a   : > { %s928_s16 = scalar_lea.hbm %s1899_s28, %s1154_s25  ;;  %p1359_p5 = pneg %p1358_p3 }
 0x50b   : > { %p1364_p8 = scmp.lt.s32.totalorder %s1362_s19, %s1356_s3 }
 0x50d   : > { %p1365_p9 = por %p1364_p8, %p1363_p6 }
 0x50f   : > { %p1366_p10 = pnand %p1365_p9, %p1359_p5 }
 0x511   : > { %1369 = shalt.err (!%p1366_p10)
}
 0x512   : > { %s1370_s11 = scalar_lea.hbm %s928_s16, 128  ;;  %s1374_s1 = scalar_lea.hbm %s1899_s28, 1024 }
 0x513   : > { %p1371_p11 = scmp.ne.s32.totalorder %s928_s16, %s1370_s11  ;;  %p1375_p4 = scmp.lt.u32.totalorder %s928_s16, %s1899_s28 }
 0x514   : > { %p1376_p2 = scmp.lt.u32.totalorder %s1374_s1, %s1370_s11  ;;  %p1378_p13 = scmp.lt.u32.totalorder %s1370_s11, %s928_s16 }
 0x515   : > { %p1372_p0 = pnand %p1371_p11, %p1641_p12 }
 0x516   : > { %p1377_p3 = por %p1376_p2, %p1375_p4 }
 0x517   : > { %p1373_p1 = pneg %p1372_p0 }
 0x518   : > { %p1379_p6 = por %p1378_p13, %p1377_p3 }
 0x51a   : > { %p1380_p5 = pnand %p1379_p6, %p1373_p1 }
 0x51c   : > { %1383 = shalt.err (!%p1380_p5)
}
 0x51d   : > { %1217 = dma.vmem_to_hbm [thread:$0]  (%p1641_p12), %s1780_s12, 128, %s928_s16, %s900_s15  }
 0x51e PF: > { %s1901_s3 = sld [smem:[#allocation10_spill]]  ;;  %p1227_p8 = scmp.ge.s32.totalorder %s1478_s23, 2 }
 0x520   : > { %p1221_p9 = pnand %p1227_p8, %p1629_p7 }
 0x524   : > { %s942_s25 = sand.u32 1, %s1901_s3  }
 0x525   : > { %s943_s29 = scalar_lea.sflag [#allocation4], %s942_s25 }
 0x526   : > { %1429 = dma.done.wait (!%p1221_p9), %s943_s29, 128  }
 0x527   : > { %1431 = vsyncadd (!%p1221_p9), %s943_s29, 4294967168  ;;  %s951_s27 = sand.u32 1, %s1438_s13   ;;  %p1902_p13 = scmp.ne.s32.totalorder %s1889_s30, 0 }
 0x528   : > { %s952_s18 = scalar_lea.sflag [#allocation6], %s951_s27 }
 0x529   : > { %p1224_p10 = pnand %p1227_p8, %p1902_p13 }
 0x52b   : > { %1433 = dma.done.wait (!%p1224_p10), %s952_s18, 128  }
 0x52c   : > { %1435 = vsyncadd (!%p1224_p10), %s952_s18, 4294967168  ;;  %s27_s23 = sadd.s32 1, %s1478_s23   ;;  %s1903_s9 = sld [smem:[#allocation9_spill]] }
 0x52d   : > { %p24_p12 = scmp.ge.s32.totalorder %s27_s23, 10   ;;  %s1904_s15 = sld [smem:[#allocation18_spill]] }
 0x52e   : > { %s1905_s10 = sld [smem:[#allocation11_spill]]  ;;  %s1906_s18 = sld [smem:[#allocation17_spill]] }
 0x52f   : > { %s1907_s19 = sld [smem:[#allocation12_spill]]  ;;  %s1908_s20 = sld [smem:[#allocation13_spill]] }
 0x530   : > { %s1909_s21 = sld [smem:[#allocation14_spill]]  ;;  %s1910_s22 = sld [smem:[#allocation16_spill]] }
 0x531   : > { %s1911_s13 = smov %s1442_s14  ;;  %s1913_s16 = smov %s1454_s17 }
 0x532   : > { %s1912_s14 = smov %s1903_s9  ;;  %26 = sbr.rel (!%p24_p12) target bundleno = 16 (0x10), region = 137 }
 0x534   : > { %s1914_s17 = smov %s1905_s10 }
 0x539   :  { %957 = vsyncpa [#allocation4], 1 }
 0x53a   :  { %959 = vsyncpa [#allocation4 + $0x1], 1 }
 0x53b   :  { %960 = vsyncpa [#allocation6], 1 }
 0x53c   :  { %962 = vsyncpa [#allocation6 + $0x1], 1 }

</bundles_post_ra>
